<compile_context>
chip_gen: v5e
topology: v5e:2x2
jax: 0.10.0
libtpu: 0.0.40
codegen_flags: <defaults>
</compile_context>

<pallas_src>
import math

import jax
import jax.numpy as jnp
from jax import lax
from jax.experimental import pallas as pl
from jax.experimental.pallas import tpu as pltpu


# ------------------------------ Pallas kernels --------------------------------
def _proj_from_cn_kernel(x_ref, w_ref, b_ref, o_ref):
    """Channels-major (NCHW backbone) path.

    x_ref: (1, C, tn)   input dtype  -- channels-major feature-map slab
    w_ref: (C, td)      bf16         -- projection weight stored (in, out)
    b_ref: (1, td)      f32          -- projection bias
    o_ref: (1, tn, td)  out dtype
    """
    x = x_ref[0]                                            # (C, tn)
    if x.dtype != jnp.bfloat16:
        x = x.astype(jnp.bfloat16)                          # in-kernel cast: no extra HBM pass
    # out[n, d] = sum_c x[c, n] * w[c, d] -- contracting dim 0 of both operands
    # fuses flatten(2).transpose(1, 2) into the matmul (no HBM relayout).
    acc = lax.dot_general(
        x, w_ref[...],
        dimension_numbers=(((0,), (0,)), ((), ())),
        preferred_element_type=jnp.float32,                 # f32 accumulation
    )                                                       # (tn, td)
    o_ref[0] = (acc + b_ref[...]).astype(o_ref.dtype)


def _proj_from_nc_kernel(x_ref, w_ref, b_ref, o_ref):
    """Tokens-major (already-flat (B, N, C)) path -- MXU-native (M,K)@(K,N).

    x_ref: (1, tn, C), w_ref: (C, td), b_ref: (1, td), o_ref: (1, tn, td)
    """
    x = x_ref[0]                                            # (tn, C)
    if x.dtype != jnp.bfloat16:
        x = x.astype(jnp.bfloat16)
    acc = jnp.dot(x, w_ref[...], preferred_element_type=jnp.float32)
    o_ref[0] = (acc + b_ref[...]).astype(o_ref.dtype)


# ------------------------------ tile selection ---------------------------------
def _choose_seq_tile(n):
    """Sequence tile: full extent when small, else 128..512 with small ragged waste."""
    if n <= 512:
        return n                                   # one full-extent tile per batch
    candidates = (512, 384, 256, 128)              # multiples of 128 (lane rule)
    for t in candidates:                           # largest tile with <=10% overhang
        if (-n % t) / n <= 0.10:
            return t
    return min(candidates, key=lambda t: pl.cdiv(n, t) * t)   # minimal total traffic


# --------------------------------- wrapper --------------------------------------
def hybrid_embed(x, proj_w, proj_b, *, out_dtype=None):
    """HybridEmbed.forward minus the external backbone.

    x       : (B, C, H, W) backbone feature map, or already-flat (B, N, C)
    proj_w  : (C, D)  -- nn.Linear weight stored (in_features, out_features)
    proj_b  : (D,)
    out_dtype defaults to x.dtype (torch convention); pass jnp.bfloat16 to halve
    output HBM writeback.
    returns : (B, H*W, D) / (B, N, D)
    """
    if x.ndim == 4:
        B, C, H, W = x.shape
        N = H * W
        x_in = x.reshape(B, C, N)                  # free reshape of contiguous dims
        channels_major = True
    elif x.ndim == 3:
        B, N, C = x.shape
        x_in = x                                   # consumed directly, no swapaxes
        channels_major = False
    else:
        raise ValueError(f"expected 3D or 4D input, got shape {x.shape}")

    if proj_w.shape[0] != C:
        raise ValueError(f"proj_w in_features {proj_w.shape[0]} != channels {C}")
    D = proj_w.shape[1]
    if out_dtype is None:
        out_dtype = x.dtype

    # ---- grid -------------------------------------------------------------
    tn = _choose_seq_tile(N)
    s_tiles = pl.cdiv(N, tn)                       # masked partial last block (no padding copy)
    # v7x has 2 TensorCores: make sure there are >= 2 "parallel" programs.
    nd = 2 if (B * s_tiles < 2 and D % 256 == 0) else 1
    td = D // nd
    grid = (B, s_tiles, nd)

    # Weight/bias are tiny (C*D); a one-time wrapper cast is negligible vs the
    # B*N*C activation traffic (which is cast in-kernel instead).
    w_bf = proj_w.astype(jnp.bfloat16)
    b_f32 = proj_b.reshape(1, D).astype(jnp.float32)

    if channels_major:
        kernel = _proj_from_cn_kernel
        x_spec = pl.BlockSpec((1, C, tn), lambda b, s, d: (b, 0, s))
    else:
        kernel = _proj_from_nc_kernel
        x_spec = pl.BlockSpec((1, tn, C), lambda b, s, d: (b, s, 0))
    o_spec = pl.BlockSpec((1, tn, td), lambda b, s, d: (b, s, d))

    # ---- VMEM budget from actual tile footprints (never the full 64 MiB of v7x)
    x_bytes = jnp.dtype(x.dtype).itemsize
    o_bytes = jnp.dtype(out_dtype).itemsize
    need = (2 * C * tn * x_bytes            # double-buffered activation tile
            + 2 * tn * td * o_bytes         # double-buffered output tile
            + C * td * 2                    # single-buffered bf16 weight
            + td * 4                        # bias
            + (4 << 20))                    # compiler-internal headroom
    vmem_limit = int(max(8 << 20, min(48 << 20, need)))

    cost = pl.CostEstimate(
        flops=2 * B * N * C * D,
        transcendentals=0,
        bytes_accessed=(x_in.size * x_bytes + C * D * 2 + D * 4 + B * N * D * o_bytes),
    )

    def _run(single_buffer_consts):
        kw = dict(pipeline_mode=pl.Buffered(1)) if single_buffer_consts else {}
        w_spec = pl.BlockSpec((C, td), lambda b, s, d: (0, d), **kw)
        b_spec = pl.BlockSpec((1, td), lambda b, s, d: (0, d), **kw)
        return pl.pallas_call(
            kernel,
            out_shape=jax.ShapeDtypeStruct((B, N, D), out_dtype),
            grid=grid,
            in_specs=[x_spec, w_spec, b_spec],
            out_specs=o_spec,
            compiler_params=pltpu.CompilerParams(
                dimension_semantics=("parallel", "parallel", "parallel"),
                vmem_limit_bytes=vmem_limit,
            ),
            cost_estimate=cost,
        )(x_in, w_bf, b_f32)

    try:
        return _run(True)
    except Exception:
        # Some jax builds reject pipeline_mode=pl.Buffered(1); the only cost of
        # the fallback is double-buffering the small constant-index w/b tiles.
        return _run(False)


# ----------------------------- pure-JAX reference -----------------------------
def reference_hybrid_embed(x, proj_w, proj_b):
    if x.ndim == 4:
        B, C, H, W = x.shape
        x = x.reshape(B, C, H * W).transpose(0, 2, 1)        # (B, N, C)
    return x.astype(jnp.float32) @ proj_w.astype(jnp.float32) + proj_b.astype(jnp.float32)


# ----------------------------------- main --------------------------------------
if __name__ == "__main__":
    key = jax.random.PRNGKey(0)
    k1, k2, k3, k4, k5, k6 = jax.random.split(key, 6)

    # ---- Case 1: 4-D NCHW backbone feature map (f32 in -> f32 out) ----------
    B, C, Hf, Wf = 2, 64, 8, 8
    D = 128
    feat = jax.random.normal(k1, (B, C, Hf, Wf), jnp.float32)
    bound = math.sqrt(6.0 / (C + D))                          # xavier-uniform
    proj_w = jax.random.uniform(k2, (C, D), jnp.float32, minval=-bound, maxval=bound)
    proj_b = jax.random.normal(k3, (D,), jnp.float32) * 1e-2

    out = jax.block_until_ready(hybrid_embed(feat, proj_w, proj_b))
    ref = reference_hybrid_embed(feat, proj_w, proj_b)
    assert out.shape == (B, Hf * Wf, D)
    assert out.dtype == feat.dtype
    assert bool(jnp.all(jnp.isfinite(out.astype(jnp.float32))))
    assert bool(jnp.allclose(out.astype(jnp.float32), ref, rtol=2e-2, atol=2e-2))

    # ---- Case 2: already-flat (B, N, C) bf16 tokens (exercises the 3-D path,
    #      bf16 writeback, and the embed-dim split for 2 TensorCores) ---------
    B2, N2, C2, D2 = 1, 50, 64, 256
    x2 = jax.random.normal(k4, (B2, N2, C2), jnp.float32).astype(jnp.bfloat16)
    bound2 = math.sqrt(6.0 / (C2 + D2))
    w2 = jax.random.uniform(k5, (C2, D2), jnp.float32, minval=-bound2, maxval=bound2)
    b2 = jax.random.normal(k6, (D2,), jnp.float32) * 1e-2

    out2 = jax.block_until_ready(hybrid_embed(x2, w2, b2))
    ref2 = reference_hybrid_embed(x2, w2, b2)
    assert out2.shape == (B2, N2, D2)
    assert out2.dtype == jnp.bfloat16
    assert bool(jnp.all(jnp.isfinite(out2.astype(jnp.float32))))
    assert bool(jnp.allclose(out2.astype(jnp.float32), ref2, rtol=5e-2, atol=5e-2))

    print("KERNEL_OK")
</pallas_src>

<mosaic_0001>
module attributes {stable_mosaic.version = 11 : i64} {
  func.func @_proj_from_cn_kernel(%arg0: i32, %arg1: i32, %arg2: i32, %arg3: memref<1x64x64xf32, #tpu.memory_space<vmem>>, %arg4: memref<64x128xbf16, #tpu.memory_space<vmem>>, %arg5: memref<1x128xf32, #tpu.memory_space<vmem>>, %arg6: memref<1x64x128xf32, #tpu.memory_space<vmem>>) attributes {dimension_semantics = [#tpu.dimension_semantics<parallel>, #tpu.dimension_semantics<parallel>, #tpu.dimension_semantics<parallel>], iteration_bounds = array<i64: 2, 1, 1>, scalar_prefetch = 0 : i64, scratch_operands = 0 : i64, tpu.core_type = #tpu.core_type<tc>, window_params = [{transform_indices = @transform_0, window_bounds = array<i64: 1, 64, 64>}, {pipeline_mode = #tpu.pipeline_mode<synchronous>, transform_indices = @transform_1, window_bounds = array<i64: 64, 128>}, {pipeline_mode = #tpu.pipeline_mode<synchronous>, transform_indices = @transform_2, window_bounds = array<i64: 1, 128>}, {transform_indices = @transform_3, window_bounds = array<i64: 1, 64, 128>}]} {
    %c0 = arith.constant 0 : index
    %c0_0 = arith.constant 0 : index
    %c0_1 = arith.constant 0 : index
    %0 = vector.load %arg3[%c0, %c0_0, %c0_1] : memref<1x64x64xf32, #tpu.memory_space<vmem>>, vector<1x64x64xf32>
    %1 = vector.shape_cast %0 : vector<1x64x64xf32> to vector<64x64xf32>
    %2 = arith.truncf %1 : vector<64x64xf32> to vector<64x64xbf16>
    %c0_2 = arith.constant 0 : index
    %c0_3 = arith.constant 0 : index
    %3 = vector.load %arg4[%c0_2, %c0_3] : memref<64x128xbf16, #tpu.memory_space<vmem>>, vector<64x128xbf16>
    %cst = arith.constant dense<0.000000e+00> : vector<64x128xf32>
    %4 = tpu.matmul %2, %3, %cst {dimension_numbers = #tpu.dot_dimension_numbers<[0], [0], [1], [1], [0, 1, 1, 1], [], []>} : vector<64x64xbf16>, vector<64x128xbf16>, vector<64x128xf32> -> vector<64x128xf32>
    %c0_4 = arith.constant 0 : index
    %c0_5 = arith.constant 0 : index
    %5 = vector.load %arg5[%c0_4, %c0_5] : memref<1x128xf32, #tpu.memory_space<vmem>>, vector<1x128xf32>
    %6 = vector.broadcast %5 : vector<1x128xf32> to vector<64x128xf32>
    %7 = arith.addf %4, %6 : vector<64x128xf32>
    %c0_6 = arith.constant 0 : index
    %c0_7 = arith.constant 0 : index
    %c0_8 = arith.constant 0 : index
    %8 = vector.load %arg6[%c0_6, %c0_7, %c0_8] : memref<1x64x128xf32, #tpu.memory_space<vmem>>, vector<1x64x128xf32>
    %9 = vector.shape_cast %8 : vector<1x64x128xf32> to vector<64x128xf32>
    %10 = vector.shape_cast %7 : vector<64x128xf32> to vector<1x64x128xf32>
    tpu.vector_store %arg6[%c0_6, %c0_7, %c0_8], %10 {strides = array<i32>} : memref<1x64x128xf32, #tpu.memory_space<vmem>>, vector<1x64x128xf32>,
    return
  }
  func.func @transform_0(%arg0: i32, %arg1: i32, %arg2: i32) -> (i32, i32, i32) {
    %c0_i32 = arith.constant 0 : i32
    %c0_i32_0 = arith.constant 0 : i32
    return %arg0, %c0_i32, %arg1 : i32, i32, i32
  }
  func.func @transform_1(%arg0: i32, %arg1: i32, %arg2: i32) -> (i32, i32) {
    %c0_i32 = arith.constant 0 : i32
    %c0_i32_0 = arith.constant 0 : i32
    return %c0_i32, %arg2 : i32, i32
  }
  func.func @transform_2(%arg0: i32, %arg1: i32, %arg2: i32) -> (i32, i32) {
    %c0_i32 = arith.constant 0 : i32
    %c0_i32_0 = arith.constant 0 : i32
    return %c0_i32, %arg2 : i32, i32
  }
  func.func @transform_3(%arg0: i32, %arg1: i32, %arg2: i32) -> (i32, i32, i32) {
    %c0_i32 = arith.constant 0 : i32
    return %arg0, %arg1, %arg2 : i32, i32, i32
  }
}

module attributes {stable_mosaic.version = 11 : i64} {
  func.func @_proj_from_cn_kernel(%arg0: i32, %arg1: i32, %arg2: i32, %arg3: memref<1x64x64xf32, #tpu.memory_space<vmem>>, %arg4: memref<64x128xbf16, #tpu.memory_space<vmem>>, %arg5: memref<1x128xf32, #tpu.memory_space<vmem>>, %arg6: memref<1x64x128xf32, #tpu.memory_space<vmem>>) attributes {dimension_semantics = [#tpu.dimension_semantics<parallel>, #tpu.dimension_semantics<parallel>, #tpu.dimension_semantics<parallel>], iteration_bounds = array<i64: 2, 1, 1>, scalar_prefetch = 0 : i64, scratch_operands = 0 : i64, tpu.core_type = #tpu.core_type<tc>, window_params = [{transform_indices = @transform_0, window_bounds = array<i64: 1, 64, 64>}, {transform_indices = @transform_1, window_bounds = array<i64: 64, 128>}, {transform_indices = @transform_2, window_bounds = array<i64: 1, 128>}, {transform_indices = @transform_3, window_bounds = array<i64: 1, 64, 128>}]} {
    %c0 = arith.constant 0 : index
    %c0_0 = arith.constant 0 : index
    %c0_1 = arith.constant 0 : index
    %0 = vector.load %arg3[%c0, %c0_0, %c0_1] : memref<1x64x64xf32, #tpu.memory_space<vmem>>, vector<1x64x64xf32>
    %1 = vector.shape_cast %0 : vector<1x64x64xf32> to vector<64x64xf32>
    %2 = arith.truncf %1 : vector<64x64xf32> to vector<64x64xbf16>
    %c0_2 = arith.constant 0 : index
    %c0_3 = arith.constant 0 : index
    %3 = vector.load %arg4[%c0_2, %c0_3] : memref<64x128xbf16, #tpu.memory_space<vmem>>, vector<64x128xbf16>
    %cst = arith.constant dense<0.000000e+00> : vector<64x128xf32>
    %4 = tpu.matmul %2, %3, %cst {dimension_numbers = #tpu.dot_dimension_numbers<[0], [0], [1], [1], [0, 1, 1, 1], [], []>} : vector<64x64xbf16>, vector<64x128xbf16>, vector<64x128xf32> -> vector<64x128xf32>
    %c0_4 = arith.constant 0 : index
    %c0_5 = arith.constant 0 : index
    %5 = vector.load %arg5[%c0_4, %c0_5] : memref<1x128xf32, #tpu.memory_space<vmem>>, vector<1x128xf32>
    %6 = vector.broadcast %5 : vector<1x128xf32> to vector<64x128xf32>
    %7 = arith.addf %4, %6 : vector<64x128xf32>
    %c0_6 = arith.constant 0 : index
    %c0_7 = arith.constant 0 : index
    %c0_8 = arith.constant 0 : index
    %8 = vector.load %arg6[%c0_6, %c0_7, %c0_8] : memref<1x64x128xf32, #tpu.memory_space<vmem>>, vector<1x64x128xf32>
    %9 = vector.shape_cast %8 : vector<1x64x128xf32> to vector<64x128xf32>
    %10 = vector.shape_cast %7 : vector<64x128xf32> to vector<1x64x128xf32>
    tpu.vector_store %arg6[%c0_6, %c0_7, %c0_8], %10 {strides = array<i32>} : memref<1x64x128xf32, #tpu.memory_space<vmem>>, vector<1x64x128xf32>,
    return
  }
  func.func @transform_0(%arg0: i32, %arg1: i32, %arg2: i32) -> (i32, i32, i32) {
    %c0_i32 = arith.constant 0 : i32
    %c0_i32_0 = arith.constant 0 : i32
    return %arg0, %c0_i32, %arg1 : i32, i32, i32
  }
  func.func @transform_1(%arg0: i32, %arg1: i32, %arg2: i32) -> (i32, i32) {
    %c0_i32 = arith.constant 0 : i32
    %c0_i32_0 = arith.constant 0 : i32
    return %c0_i32, %arg2 : i32, i32
  }
  func.func @transform_2(%arg0: i32, %arg1: i32, %arg2: i32) -> (i32, i32) {
    %c0_i32 = arith.constant 0 : i32
    %c0_i32_0 = arith.constant 0 : i32
    return %c0_i32, %arg2 : i32, i32
  }
  func.func @transform_3(%arg0: i32, %arg1: i32, %arg2: i32) -> (i32, i32, i32) {
    %c0_i32 = arith.constant 0 : i32
    return %arg0, %arg1, %arg2 : i32, i32, i32
  }
}

</mosaic_0001>

<bundles_post_ra>
// kernel: tpu_custom_call.1
= control target key start
LH: loop header
LB: loop body
LE: loop exit
PB: predicated region body
PF: predicated region fallthrough
CT: control target
= control target key end

     0   :  { %s982_s0 = inlined_call_operand.hbm [shape: f32[2,64,64], index: 0, kind: input, shape index: {}]   ;;  %s983_s1 = inlined_call_operand.hbm [shape: bf16[64,128], index: 1, kind: input, shape index: {}]   ;;  %s984_s2 = inlined_call_operand.vmem [shape: f32[1,128], index: 2, kind: input, shape index: {}]   ;;  %s985_s3 = inlined_call_operand.hbm [shape: f32[2,64,128], index: 3, kind: output, shape index: {}]  }
   0x1   :  { %986 = sst [smem:[#allocation11_spill]] %s983_s1 }
   0x2   :  { %8 = vsyncpa [#allocation3], 0 }
   0x3   :  { %10 = vsyncpa [#allocation3 + $0x1], 0 }
   0x4   :  { %11 = vsyncpa [#allocation6], 0 }
   0x5   :  { %12 = vsyncpa [#allocation4], 0 }
   0x6   :  { %14 = vsyncpa [#allocation4 + $0x1], 0  ;;  %s816_s12 = smov 0   ;;  %s818_s13 = smov 0  }
   0x7   :  { %s820_s14 = smov 0   ;;  %s822_s15 = smov 0  }
   0x8   :  { %s824_s16 = smov 0   ;;  %s826_s17 = smov 0  }
   0x9 LB: > { %s504_s18 = sadd.s32 4294967295, %s787_s17   ;;  %s505_s19 = sadd.s32 4294967294, %s787_s17   ;;  %s787_s17 = sphi %s826_s17, %s20_s17   ;;  %s783_s16 = sphi %s824_s16, %s999_s16   ;;  %s779_s15 = sphi %s822_s15, %s998_s15   ;;  %s775_s14 = sphi %s820_s14, %s997_s14   ;;  %s771_s13 = sphi %s818_s13, %s996_s13   ;;  %s767_s12 = sphi %s816_s12, %s995_s12  }
   0xa   : > { %p61_p0 = scmp.ne.s32.totalorder %s771_s13, %s767_s12  ;;  %p850_p1 = scmp.eq.s32.totalorder %s504_s18, 0 }
   0xb   : > { %p854_p2 = scmp.eq.s32.totalorder %s504_s18, 1  ;;  %p147_p3 = scmp.eq.s32.totalorder %s505_s19, 1 }
   0xc   : > { %p860_p4 = por %p850_p1, %p61_p0  ;;  %p506_p5 = scmp.ge.s32.totalorder %s787_s17, 1 }
   0xd   : > { %p865_p6 = por %p147_p3, %p61_p0  ;;  %p154_p7 = scmp.lt.s32.totalorder %s787_s17, 3 }
   0xe   : > { %s991_s1 = sld [smem:[#allocation11_spill]]  ;;  %s789_s28 = smov [#allocation5]  }
   0xf   : > { %p873_p8 = pnand %p506_p5, %p154_p7  ;;  %s169_s29 = sshll.u32 %s789_s28, 4  ;;  %s170_s29 = int_to_ptr.vmem [resolvable:$true] %s169_s29 }
  0x10   : > { %p509_p11 = scmp.ge.s32.totalorder %s787_s17, 2  ;;  %s790_s30 = smov 64  }
  0x11   : > { %p568_p9 = pneg %p873_p8  ;;  %s791_s4 = smov 4  }
  0x12   : > { %s39_s5 = sadd.s32 1, %s783_s16  ;;  %s48_s6 = sadd.s32 1, %s775_s14 }
  0x13   : > { %p569_p10 = pnand %p568_p9, %p850_p1  ;;  %p41_p12 = scmp.ge.s32.totalorder %s39_s5, 2 }
  0x14   : > { %s167_s26 = sshll.u32 %s991_s1, 4  ;;  %p55_p13 = scmp.ne.s32.totalorder %s775_s14, %s771_s13  ;;  %s168_s26 = int_to_ptr.hbm [resolvable:$true] %s167_s26 }
  0x15   : > { %571 = dma.hbm_to_vmem [thread:$0]  (!%p569_p10), %s168_s26, 512, %s170_s29, [#allocation6], %s790_s30, %s790_s30, %s791_s4  }
  0x16   : > { %p56_p0 = scmp.eq.s32.totalorder %s787_s17, 0  ;;  %s1001_s5 = smov (%p41_p12, %s39_s5), 0 }
  0x17   : > { %p895_p5 = por %p854_p2, %p55_p13  ;;  %s43_s9 = ssub.s32 %s783_s16, %s1001_s5 }
  0x18   : > { %p889_p3 = por %p56_p0, %p55_p13  ;;  %p581_p7 = scmp.lt.s32.totalorder %s787_s17, 2 }
  0x19   : > { %p46_p9 = scmp.eq.s32.totalorder %s43_s9, 0  ;;  %s189_s10 = sand.u32 1, %s775_s14  }
  0x1a   : > { %s510_s11 = sshll.u32 %s189_s10, 6  ;;  %s542_s19 = sshll.u32 %s783_s16, 6 }
  0x1b   : > { %s904_s18 = scalar_select %p46_p9, %s775_s14, %s48_s6  }
  0x1c   : > { %s199_s26 = scalar_lea.hbm %s982_s0, %s542_s19  ;;  %s193_s28 = scalar_lea.vmem [#allocation2], %s510_s11 }
  0x1d   : > { %s202_s29 = sshll.u32 %s193_s28, 4  ;;  %s200_s21 = sshll.u32 %s199_s26, 4  ;;  %s203_s29 = int_to_ptr.vmem [resolvable:$true] %s202_s29  ;;  %s201_s21 = int_to_ptr.hbm [resolvable:$true] %s200_s21 }
  0x1e   : > { %p573_p2 = pnand %p581_p7, %p889_p3  ;;  %s190_s30 = scalar_lea.sflag [#allocation3], %s189_s10 }
  0x1f   : > { %s792_s4 = smov 128   ;;  %s793_s1 = smov 8  }
  0x20   : > { %575 = dma.hbm_to_vmem [thread:$0]  (!%p573_p2), %s201_s21, 1024, %s203_s29, %s190_s30, %s792_s4, %s792_s4, %s793_s1  }
  0x21   : > { %214 = sbr.rel (%p873_p8) target bundleno = 411 (0x19b), region = 32  ;;  %s915_s6 = sand.u32 (!%p873_p8), 1, %s771_s13  }
  0x22   : > { %s514_s9 = sshll.u32 (!%p873_p8), %s915_s6, 6  ;;  %s217_s11 = scalar_lea.sflag (!%p873_p8), [#allocation3], %s915_s6 }
  0x23   : > { %s921_s19 = scalar_lea.vmem (!%p873_p8), [#allocation2], %s514_s9 }
  0x26   : > { %754 = dma.done.wait (%p860_p4), %s217_s11, 1024  }
  0x27   : > { %756 = vsyncadd (%p860_p4), %s217_s11, 4294966272 }
  0x28   : > { %758 = dma.done.wait (%p850_p1), [#allocation6], 512  }
  0x29   : > { %760 = vsyncadd (%p850_p1), [#allocation6], 4294966784  ;;  %v257_v0 = vld [vmem:[%s921_s19] sm:$0xff]  ;;  %v258_v1 = vld [vmem:[%s921_s19 + $0x8] sm:$0xff]  ;;  %vm321_vm0 = vcmask 523264   ;;  %s251_s22 = scalar_lea.vmem [#allocation7], %s514_s9 }
  0x2a   : > { %v265_v2 = vpack.c.bf16 %v258_v1, %v257_v0  ;;  %v259_v3 = vld [vmem:[%s921_s19 + $0x10] sm:$0xff]  ;;  %v260_v4 = vld [vmem:[%s921_s19 + $0x18] sm:$0xff]  ;;  %v544_v8 = vld [vmem:[#allocation5 + $0x8] sm:$0xff]  ;;  %s547_s27 = sshll.u32 %s779_s15, 6  ;;  %s387_s25 = sshll.u32 %s251_s22, 4  ;;  %s388_s25 = int_to_ptr.vmem [resolvable:$true] %s387_s25 }
  0x2b   : > { %v266_v5 = vpack.c.bf16 %v260_v4, %v259_v3  ;;  %v546_v6 = vld [vmem:[#allocation5 + $0x18] sm:$0xff]  ;;  %v545_v7 = vld [vmem:[#allocation5 + $0x10] sm:$0xff]  ;;  %v261_v9 = vld [vmem:[%s921_s19 + $0x20] sm:$0xff]  ;;  %s386_s24 = scalar_lea.hbm %s985_s3, %s547_s27  ;;  %s372_s28 = scalar_lea.sflag [#allocation4], %s915_s6 }
  0x2c   : > { %281 = vxpose.xlu0.c.b16.start [1/4] (short) (narrow) %v265_v2, 64  ;;  %338 = vmatpush.bf16.msra.mxu0 %v546_v6  ;;  %v262_v10 = vld [vmem:[%s921_s19 + $0x28] sm:$0xff]  ;;  %v543_v11 = vld [vmem:[#allocation5] sm:$0xff]  ;;  %v263_v13 = vld [vmem:[%s921_s19 + $0x30] sm:$0xff]  ;;  %s389_s26 = sshll.u32 %s386_s24, 4  ;;  %s721_s4 = scalar_lea.hbm %s985_s3, 128  ;;  %s390_s26 = int_to_ptr.hbm [resolvable:$true] %s389_s26 }
  0x2d   : > { %548 = vmatpush.bf16.msra.mxu1 %v546_v6  ;;  %549 = vmatpush.bf16.msra.mxu2 %v546_v6  ;;  %v267_v12 = vpack.c.bf16 %v262_v10, %v261_v9  ;;  %v264_v14 = vld [vmem:[%s921_s19 + $0x38] sm:$0xff]  ;;  %v640_v20 = vld [vmem:[%s984_s2] ss:$0 sm:$0xff]  ;;  %s715_s29 = sshra.s32 %s390_s26, 4  ;;  %s716_s29 = int_to_ptr.hbm [resolvable:$true] %s715_s29 }
  0x2e   : > { %550 = vmatpush.bf16.msra.mxu3 %v546_v6  ;;  %v268_v15 = vpack.c.bf16 %v264_v14, %v263_v13  ;;  %s717_s21 = scalar_lea.hbm %s716_s29, 64  ;;  %p722_p10 = scmp.lt.s32.totalorder %s716_s29, %s985_s3 }
  0x2f   : > { %p718_p1 = scmp.ne.s32.totalorder %s716_s29, %s717_s21  ;;  %p723_p12 = scmp.lt.s32.totalorder %s721_s4, %s717_s21 }
  0x30   : > { %339 = vmatpush.bf16.msra.mxu0 %v545_v7 }
  0x31   : > { %551 = vmatpush.bf16.msra.mxu1 %v545_v7  ;;  %552 = vmatpush.bf16.msra.mxu2 %v545_v7  ;;  %p719_p4 = pnand %p718_p1, %p895_p5  ;;  %p724_p13 = por %p723_p12, %p722_p10 }
  0x32   : > { %553 = vmatpush.bf16.msra.mxu3 %v545_v7 }
  0x33   : > { %p720_p8 = pneg %p719_p4 }
  0x34   : > { %340 = vmatpush.bf16.msra.mxu0 %v544_v8 }
  0x35   : > { %554 = vmatpush.bf16.msra.mxu1 %v544_v8  ;;  %555 = vmatpush.bf16.msra.mxu2 %v544_v8  ;;  %p725_p0 = pnand %p724_p13, %p720_p8 }
  0x36   : > { %556 = vmatpush.bf16.msra.mxu3 %v544_v8 }
  0x38   : > { %341 = vmatpush.bf16.msra.mxu0 %v543_v11 }
  0x39   : > { %557 = vmatpush.bf16.msra.mxu1 %v543_v11  ;;  %558 = vmatpush.bf16.msra.mxu2 %v543_v11 }
  0x3a   : > { %559 = vmatpush.bf16.msra.mxu3 %v543_v11 }
  0x3c   : > { %282 = vxpose.xlu0.c.b16.cont [2/4] (short) (narrow) %v266_v5, 64 }
  0x4c   : > { %283 = vxpose.xlu0.c.b16.cont [3/4] (short) (narrow) %v267_v12, 64 }
  0x5c   : > { %284 = vxpose.xlu0.c.b16.end [4/4] (short) (narrow) %v268_v15, 64 }
  0xd8   : > { %v289_v16 = vpop.trf.xlu0 }
  0xd9   : > { %533 = vmatmul.msk.bf16.vlgmr.msra.gmra.mxu0 %vm321_vm0, %v289_v16 }
  0xe8   : > { %v290_v17 = vpop.trf.xlu0 }
  0xe9   : > { %534 = vmatmul.msk.bf16.vlgmr.msra.gmra.mxu1 %vm321_vm0, %v290_v17 }
  0xf8   : > { %v291_v18 = vpop.trf.xlu0 }
  0xf9   : > { %535 = vmatmul.msk.bf16.vlgmr.msra.gmra.mxu2 %vm321_vm0, %v291_v18 }
 0x108   : > { %v292_v19 = vpop.trf.xlu0 }
 0x109   : > { %536 = vmatmul.msk.bf16.vlgmr.msra.gmra.mxu3 %vm321_vm0, %v292_v19 }
 0x156   : > { %v343_v21 = vpop.f32.mrf.mxu0 }
 0x157   : > { %v344_v22 = vadd.f32 %v640_v20, %v343_v21 }
 0x159   : > { %363 = vst [vmem:[%s251_s22] sm:$0xff] %v344_v22 }
 0x15e   : > { %v345_v23 = vpop.f32.mrf.mxu0 }
 0x15f   : > { %v346_v24 = vadd.f32 %v640_v20, %v345_v23 }
 0x161   : > { %364 = vst [vmem:[%s251_s22 + $0x8] sm:$0xff] %v346_v24 }
 0x166   : > { %v348_v25 = vpop.f32.mrf.mxu1 }
 0x167   : > { %v349_v26 = vadd.f32 %v640_v20, %v348_v25 }
 0x169   : > { %365 = vst [vmem:[%s251_s22 + $0x10] sm:$0xff] %v349_v26 }
 0x16e   : > { %v350_v27 = vpop.f32.mrf.mxu1 }
 0x16f   : > { %v351_v28 = vadd.f32 %v640_v20, %v350_v27 }
 0x171   : > { %366 = vst [vmem:[%s251_s22 + $0x18] sm:$0xff] %v351_v28 }
 0x17c   : > { %v353_v29 = vpop.f32.mrf.mxu2 }
 0x17d   : > { %v354_v30 = vadd.f32 %v640_v20, %v353_v29 }
 0x17f   : > { %367 = vst [vmem:[%s251_s22 + $0x20] sm:$0xff] %v354_v30 }
 0x184   : > { %v355_v31 = vpop.f32.mrf.mxu2 }
 0x185   : > { %v356_v32 = vadd.f32 %v640_v20, %v355_v31 }
 0x187   : > { %368 = vst [vmem:[%s251_s22 + $0x28] sm:$0xff] %v356_v32 }
 0x18c   : > { %v358_v33 = vpop.f32.mrf.mxu3 }
 0x18d   : > { %v359_v34 = vadd.f32 %v640_v20, %v358_v33 }
 0x18f   : > { %369 = vst [vmem:[%s251_s22 + $0x30] sm:$0xff] %v359_v34 }
 0x194   : > { %v360_v35 = vpop.f32.mrf.mxu3 }
 0x195   : > { %v361_v36 = vadd.f32 %v640_v20, %v360_v35 }
 0x197   : > { %370 = vst [vmem:[%s251_s22 + $0x38] sm:$0xff] %v361_v36 }
 0x198   : > { %728 = shalt.err (!%p725_p0)
}
 0x199   : > { %s794_s6 = smov 128   ;;  %s795_s19 = smov 8  }
 0x19a   : > { %566 = dma.vmem_to_hbm [thread:$0]  (%p895_p5), %s388_s25, 1024, %s390_s26, %s372_s28, %s794_s6, %s794_s6, %s795_s19  }
 0x19b PF: > { %s404_s1 = sand.u32 1, %s767_s12   ;;  %p577_p3 = pnand %p509_p11, %p865_p6 }
 0x19c   : > { %s405_s20 = scalar_lea.sflag [#allocation4], %s404_s1 }
 0x19d   : > { %p578_p7 = pneg %p577_p3 }
 0x19f   : > { %762 = dma.done.wait (%p578_p7), %s405_s20, 1024  }
 0x1a0   : > { %764 = vsyncadd (%p578_p7), %s405_s20, 4294966272  ;;  %s20_s17 = sadd.s32 1, %s787_s17   ;;  %s995_s12 = smov %s771_s13 }
 0x1a1   : > { %p17_p9 = scmp.ge.s32.totalorder %s20_s17, 4   ;;  %s996_s13 = smov %s775_s14 }
 0x1a2   : > { %s997_s14 = smov %s904_s18  ;;  %s998_s15 = smov %s783_s16 }
 0x1a3   : > { %s999_s16 = smov %s1001_s5  ;;  %19 = sbr.rel (!%p17_p9) target bundleno = 9 (0x9), region = 85 }
 0x1a8   :  { %411 = vsyncpa [#allocation3], 1 }
 0x1a9   :  { %413 = vsyncpa [#allocation3 + $0x1], 1 }
 0x1aa   :  { %414 = vsyncpa [#allocation6], 1 }
 0x1ab   :  { %415 = vsyncpa [#allocation4], 1 }
 0x1ac   :  { %417 = vsyncpa [#allocation4 + $0x1], 1 }

// kernel: tpu_custom_call.1
= control target key start
LH: loop header
LB: loop body
LE: loop exit
PB: predicated region body
PF: predicated region fallthrough
CT: control target
= control target key end

     0   :  { %s982_s0 = inlined_call_operand.hbm [shape: f32[2,64,64], index: 0, kind: input, shape index: {}]   ;;  %s983_s1 = inlined_call_operand.hbm [shape: bf16[64,128], index: 1, kind: input, shape index: {}]   ;;  %s984_s2 = inlined_call_operand.vmem [shape: f32[1,128], index: 2, kind: input, shape index: {}]   ;;  %s985_s3 = inlined_call_operand.hbm [shape: f32[2,64,128], index: 3, kind: output, shape index: {}]  }
   0x1   :  { %986 = sst [smem:[#allocation11_spill]] %s983_s1 }
   0x2   :  { %8 = vsyncpa [#allocation3], 0 }
   0x3   :  { %10 = vsyncpa [#allocation3 + $0x1], 0 }
   0x4   :  { %11 = vsyncpa [#allocation6], 0 }
   0x5   :  { %12 = vsyncpa [#allocation4], 0 }
   0x6   :  { %14 = vsyncpa [#allocation4 + $0x1], 0  ;;  %s816_s12 = smov 0   ;;  %s818_s13 = smov 0  }
   0x7   :  { %s820_s14 = smov 0   ;;  %s822_s15 = smov 0  }
   0x8   :  { %s824_s16 = smov 0   ;;  %s826_s17 = smov 0  }
   0x9 LB: > { %s504_s18 = sadd.s32 4294967295, %s787_s17   ;;  %s505_s19 = sadd.s32 4294967294, %s787_s17   ;;  %s787_s17 = sphi %s826_s17, %s20_s17   ;;  %s783_s16 = sphi %s824_s16, %s999_s16   ;;  %s779_s15 = sphi %s822_s15, %s998_s15   ;;  %s775_s14 = sphi %s820_s14, %s997_s14   ;;  %s771_s13 = sphi %s818_s13, %s996_s13   ;;  %s767_s12 = sphi %s816_s12, %s995_s12  }
   0xa   : > { %p61_p0 = scmp.ne.s32.totalorder %s771_s13, %s767_s12  ;;  %p850_p1 = scmp.eq.s32.totalorder %s504_s18, 0 }
   0xb   : > { %p854_p2 = scmp.eq.s32.totalorder %s504_s18, 1  ;;  %p147_p3 = scmp.eq.s32.totalorder %s505_s19, 1 }
   0xc   : > { %p860_p4 = por %p850_p1, %p61_p0  ;;  %p506_p5 = scmp.ge.s32.totalorder %s787_s17, 1 }
   0xd   : > { %p865_p6 = por %p147_p3, %p61_p0  ;;  %p154_p7 = scmp.lt.s32.totalorder %s787_s17, 3 }
   0xe   : > { %s991_s1 = sld [smem:[#allocation11_spill]]  ;;  %s789_s28 = smov [#allocation5]  }
   0xf   : > { %p873_p8 = pnand %p506_p5, %p154_p7  ;;  %s169_s29 = sshll.u32 %s789_s28, 4  ;;  %s170_s29 = int_to_ptr.vmem [resolvable:$true] %s169_s29 }
  0x10   : > { %p509_p11 = scmp.ge.s32.totalorder %s787_s17, 2  ;;  %s790_s30 = smov 64  }
  0x11   : > { %p568_p9 = pneg %p873_p8  ;;  %s791_s4 = smov 4  }
  0x12   : > { %s39_s5 = sadd.s32 1, %s783_s16  ;;  %s48_s6 = sadd.s32 1, %s775_s14 }
  0x13   : > { %p569_p10 = pnand %p568_p9, %p850_p1  ;;  %p41_p12 = scmp.ge.s32.totalorder %s39_s5, 2 }
  0x14   : > { %s167_s26 = sshll.u32 %s991_s1, 4  ;;  %p55_p13 = scmp.ne.s32.totalorder %s775_s14, %s771_s13  ;;  %s168_s26 = int_to_ptr.hbm [resolvable:$true] %s167_s26 }
  0x15   : > { %571 = dma.hbm_to_vmem [thread:$0]  (!%p569_p10), %s168_s26, 512, %s170_s29, [#allocation6], %s790_s30, %s790_s30, %s791_s4  }
  0x16   : > { %p56_p0 = scmp.eq.s32.totalorder %s787_s17, 0  ;;  %s1001_s5 = smov (%p41_p12, %s39_s5), 0 }
  0x17   : > { %p895_p5 = por %p854_p2, %p55_p13  ;;  %s43_s9 = ssub.s32 %s783_s16, %s1001_s5 }
  0x18   : > { %p889_p3 = por %p56_p0, %p55_p13  ;;  %p581_p7 = scmp.lt.s32.totalorder %s787_s17, 2 }
  0x19   : > { %p46_p9 = scmp.eq.s32.totalorder %s43_s9, 0  ;;  %s189_s10 = sand.u32 1, %s775_s14  }
  0x1a   : > { %s510_s11 = sshll.u32 %s189_s10, 6  ;;  %s542_s19 = sshll.u32 %s783_s16, 6 }
  0x1b   : > { %s904_s18 = scalar_select %p46_p9, %s775_s14, %s48_s6  }
  0x1c   : > { %s199_s26 = scalar_lea.hbm %s982_s0, %s542_s19  ;;  %s193_s28 = scalar_lea.vmem [#allocation2], %s510_s11 }
  0x1d   : > { %s202_s29 = sshll.u32 %s193_s28, 4  ;;  %s200_s21 = sshll.u32 %s199_s26, 4  ;;  %s203_s29 = int_to_ptr.vmem [resolvable:$true] %s202_s29  ;;  %s201_s21 = int_to_ptr.hbm [resolvable:$true] %s200_s21 }
  0x1e   : > { %p573_p2 = pnand %p581_p7, %p889_p3  ;;  %s190_s30 = scalar_lea.sflag [#allocation3], %s189_s10 }
  0x1f   : > { %s792_s4 = smov 128   ;;  %s793_s1 = smov 8  }
  0x20   : > { %575 = dma.hbm_to_vmem [thread:$0]  (!%p573_p2), %s201_s21, 1024, %s203_s29, %s190_s30, %s792_s4, %s792_s4, %s793_s1  }
  0x21   : > { %214 = sbr.rel (%p873_p8) target bundleno = 411 (0x19b), region = 32  ;;  %s915_s6 = sand.u32 (!%p873_p8), 1, %s771_s13  }
  0x22   : > { %s514_s9 = sshll.u32 (!%p873_p8), %s915_s6, 6  ;;  %s217_s11 = scalar_lea.sflag (!%p873_p8), [#allocation3], %s915_s6 }
  0x23   : > { %s921_s19 = scalar_lea.vmem (!%p873_p8), [#allocation2], %s514_s9 }
  0x26   : > { %754 = dma.done.wait (%p860_p4), %s217_s11, 1024  }
  0x27   : > { %756 = vsyncadd (%p860_p4), %s217_s11, 4294966272 }
  0x28   : > { %758 = dma.done.wait (%p850_p1), [#allocation6], 512  }
  0x29   : > { %760 = vsyncadd (%p850_p1), [#allocation6], 4294966784  ;;  %v257_v0 = vld [vmem:[%s921_s19] sm:$0xff]  ;;  %v258_v1 = vld [vmem:[%s921_s19 + $0x8] sm:$0xff]  ;;  %vm321_vm0 = vcmask 523264   ;;  %s251_s22 = scalar_lea.vmem [#allocation7], %s514_s9 }
  0x2a   : > { %v265_v2 = vpack.c.bf16 %v258_v1, %v257_v0  ;;  %v259_v3 = vld [vmem:[%s921_s19 + $0x10] sm:$0xff]  ;;  %v260_v4 = vld [vmem:[%s921_s19 + $0x18] sm:$0xff]  ;;  %v544_v8 = vld [vmem:[#allocation5 + $0x8] sm:$0xff]  ;;  %s547_s27 = sshll.u32 %s779_s15, 6  ;;  %s387_s25 = sshll.u32 %s251_s22, 4  ;;  %s388_s25 = int_to_ptr.vmem [resolvable:$true] %s387_s25 }
  0x2b   : > { %v266_v5 = vpack.c.bf16 %v260_v4, %v259_v3  ;;  %v546_v6 = vld [vmem:[#allocation5 + $0x18] sm:$0xff]  ;;  %v545_v7 = vld [vmem:[#allocation5 + $0x10] sm:$0xff]  ;;  %v261_v9 = vld [vmem:[%s921_s19 + $0x20] sm:$0xff]  ;;  %s386_s24 = scalar_lea.hbm %s985_s3, %s547_s27  ;;  %s372_s28 = scalar_lea.sflag [#allocation4], %s915_s6 }
  0x2c   : > { %281 = vxpose.xlu0.c.b16.start [1/4] (short) (narrow) %v265_v2, 64  ;;  %338 = vmatpush.bf16.msra.mxu0 %v546_v6  ;;  %v262_v10 = vld [vmem:[%s921_s19 + $0x28] sm:$0xff]  ;;  %v543_v11 = vld [vmem:[#allocation5] sm:$0xff]  ;;  %v263_v13 = vld [vmem:[%s921_s19 + $0x30] sm:$0xff]  ;;  %s389_s26 = sshll.u32 %s386_s24, 4  ;;  %s721_s4 = scalar_lea.hbm %s985_s3, 128  ;;  %s390_s26 = int_to_ptr.hbm [resolvable:$true] %s389_s26 }
  0x2d   : > { %548 = vmatpush.bf16.msra.mxu1 %v546_v6  ;;  %549 = vmatpush.bf16.msra.mxu2 %v546_v6  ;;  %v267_v12 = vpack.c.bf16 %v262_v10, %v261_v9  ;;  %v264_v14 = vld [vmem:[%s921_s19 + $0x38] sm:$0xff]  ;;  %v640_v20 = vld [vmem:[%s984_s2] ss:$0 sm:$0xff]  ;;  %s715_s29 = sshra.s32 %s390_s26, 4  ;;  %s716_s29 = int_to_ptr.hbm [resolvable:$true] %s715_s29 }
  0x2e   : > { %550 = vmatpush.bf16.msra.mxu3 %v546_v6  ;;  %v268_v15 = vpack.c.bf16 %v264_v14, %v263_v13  ;;  %s717_s21 = scalar_lea.hbm %s716_s29, 64  ;;  %p722_p10 = scmp.lt.s32.totalorder %s716_s29, %s985_s3 }
  0x2f   : > { %p718_p1 = scmp.ne.s32.totalorder %s716_s29, %s717_s21  ;;  %p723_p12 = scmp.lt.s32.totalorder %s721_s4, %s717_s21 }
  0x30   : > { %339 = vmatpush.bf16.msra.mxu0 %v545_v7 }
  0x31   : > { %551 = vmatpush.bf16.msra.mxu1 %v545_v7  ;;  %552 = vmatpush.bf16.msra.mxu2 %v545_v7  ;;  %p719_p4 = pnand %p718_p1, %p895_p5  ;;  %p724_p13 = por %p723_p12, %p722_p10 }
  0x32   : > { %553 = vmatpush.bf16.msra.mxu3 %v545_v7 }
  0x33   : > { %p720_p8 = pneg %p719_p4 }
  0x34   : > { %340 = vmatpush.bf16.msra.mxu0 %v544_v8 }
  0x35   : > { %554 = vmatpush.bf16.msra.mxu1 %v544_v8  ;;  %555 = vmatpush.bf16.msra.mxu2 %v544_v8  ;;  %p725_p0 = pnand %p724_p13, %p720_p8 }
  0x36   : > { %556 = vmatpush.bf16.msra.mxu3 %v544_v8 }
  0x38   : > { %341 = vmatpush.bf16.msra.mxu0 %v543_v11 }
  0x39   : > { %557 = vmatpush.bf16.msra.mxu1 %v543_v11  ;;  %558 = vmatpush.bf16.msra.mxu2 %v543_v11 }
  0x3a   : > { %559 = vmatpush.bf16.msra.mxu3 %v543_v11 }
  0x3c   : > { %282 = vxpose.xlu0.c.b16.cont [2/4] (short) (narrow) %v266_v5, 64 }
  0x4c   : > { %283 = vxpose.xlu0.c.b16.cont [3/4] (short) (narrow) %v267_v12, 64 }
  0x5c   : > { %284 = vxpose.xlu0.c.b16.end [4/4] (short) (narrow) %v268_v15, 64 }
  0xd8   : > { %v289_v16 = vpop.trf.xlu0 }
  0xd9   : > { %533 = vmatmul.msk.bf16.vlgmr.msra.gmra.mxu0 %vm321_vm0, %v289_v16 }
  0xe8   : > { %v290_v17 = vpop.trf.xlu0 }
  0xe9   : > { %534 = vmatmul.msk.bf16.vlgmr.msra.gmra.mxu1 %vm321_vm0, %v290_v17 }
  0xf8   : > { %v291_v18 = vpop.trf.xlu0 }
  0xf9   : > { %535 = vmatmul.msk.bf16.vlgmr.msra.gmra.mxu2 %vm321_vm0, %v291_v18 }
 0x108   : > { %v292_v19 = vpop.trf.xlu0 }
 0x109   : > { %536 = vmatmul.msk.bf16.vlgmr.msra.gmra.mxu3 %vm321_vm0, %v292_v19 }
 0x156   : > { %v343_v21 = vpop.f32.mrf.mxu0 }
 0x157   : > { %v344_v22 = vadd.f32 %v640_v20, %v343_v21 }
 0x159   : > { %363 = vst [vmem:[%s251_s22] sm:$0xff] %v344_v22 }
 0x15e   : > { %v345_v23 = vpop.f32.mrf.mxu0 }
 0x15f   : > { %v346_v24 = vadd.f32 %v640_v20, %v345_v23 }
 0x161   : > { %364 = vst [vmem:[%s251_s22 + $0x8] sm:$0xff] %v346_v24 }
 0x166   : > { %v348_v25 = vpop.f32.mrf.mxu1 }
 0x167   : > { %v349_v26 = vadd.f32 %v640_v20, %v348_v25 }
 0x169   : > { %365 = vst [vmem:[%s251_s22 + $0x10] sm:$0xff] %v349_v26 }
 0x16e   : > { %v350_v27 = vpop.f32.mrf.mxu1 }
 0x16f   : > { %v351_v28 = vadd.f32 %v640_v20, %v350_v27 }
 0x171   : > { %366 = vst [vmem:[%s251_s22 + $0x18] sm:$0xff] %v351_v28 }
 0x17c   : > { %v353_v29 = vpop.f32.mrf.mxu2 }
 0x17d   : > { %v354_v30 = vadd.f32 %v640_v20, %v353_v29 }
 0x17f   : > { %367 = vst [vmem:[%s251_s22 + $0x20] sm:$0xff] %v354_v30 }
 0x184   : > { %v355_v31 = vpop.f32.mrf.mxu2 }
 0x185   : > { %v356_v32 = vadd.f32 %v640_v20, %v355_v31 }
 0x187   : > { %368 = vst [vmem:[%s251_s22 + $0x28] sm:$0xff] %v356_v32 }
 0x18c   : > { %v358_v33 = vpop.f32.mrf.mxu3 }
 0x18d   : > { %v359_v34 = vadd.f32 %v640_v20, %v358_v33 }
 0x18f   : > { %369 = vst [vmem:[%s251_s22 + $0x30] sm:$0xff] %v359_v34 }
 0x194   : > { %v360_v35 = vpop.f32.mrf.mxu3 }
 0x195   : > { %v361_v36 = vadd.f32 %v640_v20, %v360_v35 }
 0x197   : > { %370 = vst [vmem:[%s251_s22 + $0x38] sm:$0xff] %v361_v36 }
 0x198   : > { %728 = shalt.err (!%p725_p0)
}
 0x199   : > { %s794_s6 = smov 128   ;;  %s795_s19 = smov 8  }
 0x19a   : > { %566 = dma.vmem_to_hbm [thread:$0]  (%p895_p5), %s388_s25, 1024, %s390_s26, %s372_s28, %s794_s6, %s794_s6, %s795_s19  }
 0x19b PF: > { %s404_s1 = sand.u32 1, %s767_s12   ;;  %p577_p3 = pnand %p509_p11, %p865_p6 }
 0x19c   : > { %s405_s20 = scalar_lea.sflag [#allocation4], %s404_s1 }
 0x19d   : > { %p578_p7 = pneg %p577_p3 }
 0x19f   : > { %762 = dma.done.wait (%p578_p7), %s405_s20, 1024  }
 0x1a0   : > { %764 = vsyncadd (%p578_p7), %s405_s20, 4294966272  ;;  %s20_s17 = sadd.s32 1, %s787_s17   ;;  %s995_s12 = smov %s771_s13 }
 0x1a1   : > { %p17_p9 = scmp.ge.s32.totalorder %s20_s17, 4   ;;  %s996_s13 = smov %s775_s14 }
 0x1a2   : > { %s997_s14 = smov %s904_s18  ;;  %s998_s15 = smov %s783_s16 }
 0x1a3   : > { %s999_s16 = smov %s1001_s5  ;;  %19 = sbr.rel (!%p17_p9) target bundleno = 9 (0x9), region = 85 }
 0x1a8   :  { %411 = vsyncpa [#allocation3], 1 }
 0x1a9   :  { %413 = vsyncpa [#allocation3 + $0x1], 1 }
 0x1aa   :  { %414 = vsyncpa [#allocation6], 1 }
 0x1ab   :  { %415 = vsyncpa [#allocation4], 1 }
 0x1ac   :  { %417 = vsyncpa [#allocation4 + $0x1], 1 }

</bundles_post_ra>
